<compile_context>
chip_gen: v7x
topology: tpu7x:2x2x1
jax: 0.10.0
libtpu: 0.0.40
codegen_flags: <defaults>
</compile_context>

<pallas_src>
import functools
import math

import jax
import jax.numpy as jnp
from jax.experimental import pallas as pl
from jax.experimental.pallas import tpu as pltpu


# ---------------------------------------------------------------------------
# Activations (static, resolved at trace time).
# ---------------------------------------------------------------------------
def _activate(z, activation):
    if activation == "linear":
        return z
    if activation == "relu":
        return jnp.maximum(z, 0.0)
    if activation == "sigmoid":
        # Single EUP op (tanh) instead of exp + reciprocal (2 EUP ops).
        return 0.5 * (jnp.tanh(0.5 * z) + 1.0)
    if activation == "softmax":
        # PyTorch softmax(dim=1) == over the channel axis == axis 0 of (n_out, T_tile).
        z = z - jnp.max(z, axis=0, keepdims=True)
        e = jnp.exp(z)
        return e / jnp.sum(e, axis=0, keepdims=True)
    raise ValueError(f"unsupported activation: {activation}")


# ---------------------------------------------------------------------------
# Kernel 1: conv heads + activation + clamp + streaming attention pool over T.
# ---------------------------------------------------------------------------
def attention_pool_kernel(x_ref, w_att_ref, b_att_ref, w_cla_ref, b_cla_ref,
                          att_ref, den_ref, out_ref,
                          *, att_activation, cla_activation):
    # x_ref:   (C_in, T_tile)        w_*_ref: (n_out, C_in)   b_*_ref: (n_out, 1)
    # att_ref: (n_out, T_tile)       den_ref/out_ref: (n_out, 1)  (VMEM-resident over T)
    t = pl.program_id(1)

    @pl.when(t == 0)
    def _init():
        den_ref[...] = jnp.zeros_like(den_ref)
        out_ref[...] = jnp.zeros_like(out_ref)

    x = x_ref[...]

    # 1x1 conv == channel matmul on the MXU, f32 accumulation, T on lanes.
    att_logits = jnp.dot(w_att_ref[...], x,
                         preferred_element_type=jnp.float32) + b_att_ref[...]
    cla_logits = jnp.dot(w_cla_ref[...], x,
                         preferred_element_type=jnp.float32) + b_cla_ref[...]

    att = _activate(att_logits, att_activation)
    cla = _activate(cla_logits, cla_activation)

    eps = 1e-7
    att = jnp.clip(att, eps, 1.0 - eps)

    # Clamped attention weights are needed later for norm_att.
    att_ref[...] = att.astype(att_ref.dtype)

    # Streaming accumulation over time tiles (lane reduction -> (n_out, 1)).
    den_ref[...] += jnp.sum(att, axis=1, keepdims=True)
    out_ref[...] += jnp.sum(att * cla, axis=1, keepdims=True)

    @pl.when(t == pl.num_programs(1) - 1)
    def _finalize():
        # out = sum(att*cla) / sum(att)  ==  sum(norm_att * cla)
        out_ref[...] = out_ref[...] / den_ref[...]


# ---------------------------------------------------------------------------
# Kernel 2: norm_att = clamped att / sum_T(att)   (needs the full denominator).
# ---------------------------------------------------------------------------
def normalize_kernel(att_ref, den_ref, norm_ref):
    # att_ref/norm_ref: (n_out, T_tile)   den_ref: (n_out, 1)
    norm_ref[...] = att_ref[...] / den_ref[...]


# ---------------------------------------------------------------------------
# Wrapper
# ---------------------------------------------------------------------------
def _pick_t_tile(T):
    # Prefer lane-dense, 128-aligned tiles that divide T; otherwise take the full axis.
    # TODO(synk): for very long T that is not a multiple of 128, pad/mask the tail tile.
    for cand in (1024, 512, 256, 128):
        if T % cand == 0:
            return cand
    return T


def attention_forward(x_nchw, w_att, b_att, w_cla, b_cla,
                      att_activation="sigmoid", cla_activation="sigmoid",
                      compute_dtype=jnp.float32):
    """x_nchw: (B, n_in, T, 1); w_*: (n_out, n_in) from the 1x1 convs; b_*: (n_out,)."""
    B, C_in, T, W = x_nchw.shape
    assert W == 1, "Attention expects trailing spatial dim of size 1"
    n_out = w_att.shape[0]

    # Native layout: only squeeze W=1 (no transpose -> no extra HBM pass).
    x_bct = x_nchw[:, :, :, 0]                                    # (B, C_in, T)
    if x_bct.dtype != compute_dtype:
        x_bct = x_bct.astype(compute_dtype)                       # e.g. bf16 inputs
    w_att_k = w_att.astype(compute_dtype)
    w_cla_k = w_cla.astype(compute_dtype)
    b_att_k = b_att.reshape(n_out, 1).astype(jnp.float32)
    b_cla_k = b_cla.reshape(n_out, 1).astype(jnp.float32)

    t_tile = _pick_t_tile(T)
    n_t = T // t_tile
    in_itemsize = jnp.dtype(compute_dtype).itemsize

    # Advisory cost estimate (2 conv heads).
    flops = 2 * 2 * B * T * C_in * n_out
    transcendentals = B * T * n_out * (
        int(att_activation in ("sigmoid", "softmax"))
        + int(cla_activation in ("sigmoid", "softmax")))
    bytes_accessed = (B * C_in * T * in_itemsize            # x
                      + 2 * n_out * C_in * in_itemsize      # weights
                      + B * n_out * T * 4                   # clamped att out
                      + 2 * B * n_out * 4)                  # den + out

    # VMEM budget: double-buffered x + att tiles + weights + slack; keep within
    # v7x's 64 MiB physical VMEM.
    vmem_need = (2 * C_in * t_tile * in_itemsize
                 + 2 * n_out * t_tile * 4
                 + 2 * n_out * C_in * in_itemsize
                 + (4 << 20))
    vmem_limit = int(min(max(vmem_need, 32 << 20), 64 << 20))

    kernel = functools.partial(attention_pool_kernel,
                               att_activation=att_activation,
                               cla_activation=cla_activation)

    att_clamped, den, out = pl.pallas_call(
        kernel,
        out_shape=(
            jax.ShapeDtypeStruct((B, n_out, T), jnp.float32),   # clamped att
            jax.ShapeDtypeStruct((B, n_out, 1), jnp.float32),   # sum_T(att)
            jax.ShapeDtypeStruct((B, n_out, 1), jnp.float32),   # pooled output
        ),
        grid_spec=pltpu.PrefetchScalarGridSpec(
            num_scalar_prefetch=0,
            grid=(B, n_t),
            in_specs=[
                pl.BlockSpec((None, C_in, t_tile), lambda b, t: (b, 0, t)),
                pl.BlockSpec((n_out, C_in), lambda b, t: (0, 0)),
                pl.BlockSpec((n_out, 1), lambda b, t: (0, 0)),
                pl.BlockSpec((n_out, C_in), lambda b, t: (0, 0)),
                pl.BlockSpec((n_out, 1), lambda b, t: (0, 0)),
            ],
            out_specs=[
                pl.BlockSpec((None, n_out, t_tile), lambda b, t: (b, 0, t)),
                pl.BlockSpec((None, n_out, 1), lambda b, t: (b, 0, 0)),
                pl.BlockSpec((None, n_out, 1), lambda b, t: (b, 0, 0)),
            ],
        ),
        compiler_params=pltpu.CompilerParams(
            dimension_semantics=("parallel", "arbitrary"),
            vmem_limit_bytes=vmem_limit,
        ),
        cost_estimate=pl.CostEstimate(flops=flops,
                                      transcendentals=transcendentals,
                                      bytes_accessed=bytes_accessed),
    )(x_bct, w_att_k, b_att_k, w_cla_k, b_cla_k)

    norm_att = pl.pallas_call(
        normalize_kernel,
        out_shape=jax.ShapeDtypeStruct((B, n_out, T), jnp.float32),
        grid_spec=pltpu.PrefetchScalarGridSpec(
            num_scalar_prefetch=0,
            grid=(B, n_t),
            in_specs=[
                pl.BlockSpec((None, n_out, t_tile), lambda b, t: (b, 0, t)),
                pl.BlockSpec((None, n_out, 1), lambda b, t: (b, 0, 0)),
            ],
            out_specs=pl.BlockSpec((None, n_out, t_tile), lambda b, t: (b, 0, t)),
        ),
        compiler_params=pltpu.CompilerParams(
            dimension_semantics=("parallel", "parallel")),
    )(att_clamped, den)

    return out[:, :, 0], norm_att


# ---------------------------------------------------------------------------
# init_layer equivalent for a 1x1 Conv2d: n = n_in*1*1, std = sqrt(2/n),
# scale = std*sqrt(3), weight ~ U(-scale, scale), bias = 0.
# ---------------------------------------------------------------------------
def init_attention_conv_params(key, n_in, n_out):
    n = n_in * 1 * 1
    scale = math.sqrt(2.0 / n) * math.sqrt(3.0)
    weight = jax.random.uniform(key, (n_out, n_in), jnp.float32,
                                minval=-scale, maxval=scale)
    bias = jnp.zeros((n_out,), jnp.float32)
    return weight, bias


# ---------------------------------------------------------------------------
# Pure-JAX reference of the PyTorch forward.
# ---------------------------------------------------------------------------
def attention_ref(x_nchw, w_att, b_att, w_cla, b_cla, att_activation, cla_activation):
    def act(z, a):
        if a == "linear":
            return z
        if a == "relu":
            return jax.nn.relu(z)
        if a == "sigmoid":
            return jax.nn.sigmoid(z)
        if a == "softmax":
            return jax.nn.softmax(z, axis=1)
        raise ValueError(a)

    x = x_nchw[:, :, :, 0]                                             # (B, C_in, T)
    att = jnp.einsum("bct,oc->bot", x, w_att) + b_att[None, :, None]
    cla = jnp.einsum("bct,oc->bot", x, w_cla) + b_cla[None, :, None]
    att = act(att, att_activation)
    cla = act(cla, cla_activation)
    att = jnp.clip(att, 1e-7, 1.0 - 1e-7)
    norm_att = att / jnp.sum(att, axis=2, keepdims=True)
    out = jnp.sum(norm_att * cla, axis=2)
    return out, norm_att


if __name__ == "__main__":
    key = jax.random.PRNGKey(0)
    k_x, k_att, k_cla = jax.random.split(key, 3)

    B, n_in, T, n_out = 2, 4, 16, 6
    att_activation, cla_activation = "sigmoid", "sigmoid"

    x = jax.random.normal(k_x, (B, n_in, T, 1), jnp.float32)   # (samples, freq_bins, time, 1)
    w_att, b_att = init_attention_conv_params(k_att, n_in, n_out)
    w_cla, b_cla = init_attention_conv_params(k_cla, n_in, n_out)

    out, norm_att = attention_forward(x, w_att, b_att, w_cla, b_cla,
                                      att_activation, cla_activation)
    out = jax.block_until_ready(out)
    norm_att = jax.block_until_ready(norm_att)

    ref_out, ref_norm = attention_ref(x, w_att, b_att, w_cla, b_cla,
                                      att_activation, cla_activation)

    assert out.shape == (B, n_out)
    assert norm_att.shape == (B, n_out, T)
    assert jnp.allclose(out, ref_out, atol=1e-4, rtol=1e-4)
    assert jnp.allclose(norm_att, ref_norm, atol=1e-4, rtol=1e-4)
    print("KERNEL_OK")
</pallas_src>

<mosaic_0001>
module attributes {stable_mosaic.version = 11 : i64} {
  func.func @attention_pool_kernel(%arg0: i32, %arg1: i32, %arg2: memref<1x4x16xf32, #tpu.memory_space<vmem>>, %arg3: memref<6x4xf32, #tpu.memory_space<vmem>>, %arg4: memref<6x1xf32, #tpu.memory_space<vmem>>, %arg5: memref<6x4xf32, #tpu.memory_space<vmem>>, %arg6: memref<6x1xf32, #tpu.memory_space<vmem>>, %arg7: memref<1x6x16xf32, #tpu.memory_space<vmem>>, %arg8: memref<1x6x1xf32, #tpu.memory_space<vmem>>, %arg9: memref<1x6x1xf32, #tpu.memory_space<vmem>>) attributes {dimension_semantics = [#tpu.dimension_semantics<parallel>, #tpu.dimension_semantics<arbitrary>], iteration_bounds = array<i64: 2, 1>, scalar_prefetch = 0 : i64, scratch_operands = 0 : i64, tpu.core_type = #tpu.core_type<tc>, window_params = [{transform_indices = @transform_0, window_bounds = array<i64: 1, 4, 16>}, {pipeline_mode = #tpu.pipeline_mode<synchronous>, transform_indices = @transform_1, window_bounds = array<i64: 6, 4>}, {pipeline_mode = #tpu.pipeline_mode<synchronous>, transform_indices = @transform_2, window_bounds = array<i64: 6, 1>}, {pipeline_mode = #tpu.pipeline_mode<synchronous>, transform_indices = @transform_3, window_bounds = array<i64: 6, 4>}, {pipeline_mode = #tpu.pipeline_mode<synchronous>, transform_indices = @transform_4, window_bounds = array<i64: 6, 1>}, {transform_indices = @transform_5, window_bounds = array<i64: 1, 6, 16>}, {transform_indices = @transform_6, window_bounds = array<i64: 1, 6, 1>}, {transform_indices = @transform_7, window_bounds = array<i64: 1, 6, 1>}]} {
    %c0_i32 = arith.constant 0 : i32
    %0 = arith.cmpi eq, %arg1, %c0_i32 : i32
    %1 = arith.extui %0 : i1 to i32
    %c0_i32_0 = arith.constant 0 : i32
    %2 = arith.cmpi ne, %1, %c0_i32_0 : i32
    scf.if %2 {
      %cst_39 = arith.constant 0.000000e+00 : f32
      %56 = vector.broadcast %cst_39 : f32 to vector<6x1xf32>
      %c0_40 = arith.constant 0 : index
      %c0_41 = arith.constant 0 : index
      %c0_42 = arith.constant 0 : index
      %57 = vector.load %arg8[%c0_40, %c0_41, %c0_42] : memref<1x6x1xf32, #tpu.memory_space<vmem>>, vector<1x6x1xf32>
      %58 = vector.shape_cast %57 : vector<1x6x1xf32> to vector<6x1xf32>
      %59 = vector.shape_cast %56 : vector<6x1xf32> to vector<1x6x1xf32>
      tpu.vector_store %arg8[%c0_40, %c0_41, %c0_42], %59 {strides = array<i32>} : memref<1x6x1xf32, #tpu.memory_space<vmem>>, vector<1x6x1xf32>,
      %cst_43 = arith.constant 0.000000e+00 : f32
      %60 = vector.broadcast %cst_43 : f32 to vector<6x1xf32>
      %c0_44 = arith.constant 0 : index
      %c0_45 = arith.constant 0 : index
      %c0_46 = arith.constant 0 : index
      %61 = vector.load %arg9[%c0_44, %c0_45, %c0_46] : memref<1x6x1xf32, #tpu.memory_space<vmem>>, vector<1x6x1xf32>
      %62 = vector.shape_cast %61 : vector<1x6x1xf32> to vector<6x1xf32>
      %63 = vector.shape_cast %60 : vector<6x1xf32> to vector<1x6x1xf32>
      tpu.vector_store %arg9[%c0_44, %c0_45, %c0_46], %63 {strides = array<i32>} : memref<1x6x1xf32, #tpu.memory_space<vmem>>, vector<1x6x1xf32>,
    } else {
    }
    %c0 = arith.constant 0 : index
    %c0_1 = arith.constant 0 : index
    %c0_2 = arith.constant 0 : index
    %3 = vector.load %arg2[%c0, %c0_1, %c0_2] : memref<1x4x16xf32, #tpu.memory_space<vmem>>, vector<1x4x16xf32>
    %4 = vector.shape_cast %3 : vector<1x4x16xf32> to vector<4x16xf32>
    %c0_3 = arith.constant 0 : index
    %c0_4 = arith.constant 0 : index
    %5 = vector.load %arg3[%c0_3, %c0_4] : memref<6x4xf32, #tpu.memory_space<vmem>>, vector<6x4xf32>
    %cst = arith.constant dense<0.000000e+00> : vector<6x16xf32>
    %6 = tpu.matmul %5, %4, %cst {dimension_numbers = #tpu.dot_dimension_numbers<[1], [0], [0], [1], [0, 0, 1, 1], [], []>} : vector<6x4xf32>, vector<4x16xf32>, vector<6x16xf32> -> vector<6x16xf32>
    %c0_5 = arith.constant 0 : index
    %c0_6 = arith.constant 0 : index
    %7 = vector.load %arg4[%c0_5, %c0_6] : memref<6x1xf32, #tpu.memory_space<vmem>>, vector<6x1xf32>
    %8 = vector.broadcast %7 : vector<6x1xf32> to vector<6x16xf32>
    %9 = arith.addf %6, %8 : vector<6x16xf32>
    %c0_7 = arith.constant 0 : index
    %c0_8 = arith.constant 0 : index
    %10 = vector.load %arg5[%c0_7, %c0_8] : memref<6x4xf32, #tpu.memory_space<vmem>>, vector<6x4xf32>
    %cst_9 = arith.constant dense<0.000000e+00> : vector<6x16xf32>
    %11 = tpu.matmul %10, %4, %cst_9 {dimension_numbers = #tpu.dot_dimension_numbers<[1], [0], [0], [1], [0, 0, 1, 1], [], []>} : vector<6x4xf32>, vector<4x16xf32>, vector<6x16xf32> -> vector<6x16xf32>
    %c0_10 = arith.constant 0 : index
    %c0_11 = arith.constant 0 : index
    %12 = vector.load %arg6[%c0_10, %c0_11] : memref<6x1xf32, #tpu.memory_space<vmem>>, vector<6x1xf32>
    %13 = vector.broadcast %12 : vector<6x1xf32> to vector<6x16xf32>
    %14 = arith.addf %11, %13 : vector<6x16xf32>
    %cst_12 = arith.constant 5.000000e-01 : f32
    %15 = vector.broadcast %cst_12 : f32 to vector<6x16xf32>
    %16 = arith.mulf %15, %9 : vector<6x16xf32>
    %17 = math.tanh %16 : vector<6x16xf32>
    %cst_13 = arith.constant 1.000000e+00 : f32
    %18 = vector.broadcast %cst_13 : f32 to vector<6x16xf32>
    %19 = arith.addf %17, %18 : vector<6x16xf32>
    %cst_14 = arith.constant 5.000000e-01 : f32
    %20 = vector.broadcast %cst_14 : f32 to vector<6x16xf32>
    %21 = arith.mulf %20, %19 : vector<6x16xf32>
    %cst_15 = arith.constant 5.000000e-01 : f32
    %22 = vector.broadcast %cst_15 : f32 to vector<6x16xf32>
    %23 = arith.mulf %22, %14 : vector<6x16xf32>
    %24 = math.tanh %23 : vector<6x16xf32>
    %cst_16 = arith.constant 1.000000e+00 : f32
    %25 = vector.broadcast %cst_16 : f32 to vector<6x16xf32>
    %26 = arith.addf %24, %25 : vector<6x16xf32>
    %cst_17 = arith.constant 5.000000e-01 : f32
    %27 = vector.broadcast %cst_17 : f32 to vector<6x16xf32>
    %28 = arith.mulf %27, %26 : vector<6x16xf32>
    %cst_18 = arith.constant 1.000000e-07 : f32
    %cst_19 = arith.constant 0.99999988 : f32
    %29 = vector.broadcast %cst_18 : f32 to vector<6x16xf32>
    %30 = arith.maximumf %29, %21 : vector<6x16xf32>
    %31 = vector.broadcast %cst_19 : f32 to vector<6x16xf32>
    %32 = arith.minimumf %31, %30 : vector<6x16xf32>
    %c0_20 = arith.constant 0 : index
    %c0_21 = arith.constant 0 : index
    %c0_22 = arith.constant 0 : index
    %33 = vector.load %arg7[%c0_20, %c0_21, %c0_22] : memref<1x6x16xf32, #tpu.memory_space<vmem>>, vector<1x6x16xf32>
    %34 = vector.shape_cast %33 : vector<1x6x16xf32> to vector<6x16xf32>
    %35 = vector.shape_cast %32 : vector<6x16xf32> to vector<1x6x16xf32>
    tpu.vector_store %arg7[%c0_20, %c0_21, %c0_22], %35 {strides = array<i32>} : memref<1x6x16xf32, #tpu.memory_space<vmem>>, vector<1x6x16xf32>,
    %c0_23 = arith.constant 0 : index
    %c0_24 = arith.constant 0 : index
    %c0_25 = arith.constant 0 : index
    %36 = vector.load %arg8[%c0_23, %c0_24, %c0_25] : memref<1x6x1xf32, #tpu.memory_space<vmem>>, vector<1x6x1xf32>
    %37 = vector.shape_cast %36 : vector<1x6x1xf32> to vector<6x1xf32>
    %cst_26 = arith.constant dense<0.000000e+00> : vector<6xf32>
    %38 = vector.multi_reduction <add>, %32, %cst_26 [1] : vector<6x16xf32> to vector<6xf32>
    %39 = vector.shape_cast %38 : vector<6xf32> to vector<6x1xf32>
    %40 = arith.addf %37, %39 : vector<6x1xf32>
    %c0_27 = arith.constant 0 : index
    %c0_28 = arith.constant 0 : index
    %c0_29 = arith.constant 0 : index
    %41 = vector.load %arg8[%c0_27, %c0_28, %c0_29] : memref<1x6x1xf32, #tpu.memory_space<vmem>>, vector<1x6x1xf32>
    %42 = vector.shape_cast %41 : vector<1x6x1xf32> to vector<6x1xf32>
    %43 = vector.shape_cast %40 : vector<6x1xf32> to vector<1x6x1xf32>
    tpu.vector_store %arg8[%c0_27, %c0_28, %c0_29], %43 {strides = array<i32>} : memref<1x6x1xf32, #tpu.memory_space<vmem>>, vector<1x6x1xf32>,
    %c0_30 = arith.constant 0 : index
    %c0_31 = arith.constant 0 : index
    %c0_32 = arith.constant 0 : index
    %44 = vector.load %arg9[%c0_30, %c0_31, %c0_32] : memref<1x6x1xf32, #tpu.memory_space<vmem>>, vector<1x6x1xf32>
    %45 = vector.shape_cast %44 : vector<1x6x1xf32> to vector<6x1xf32>
    %46 = arith.mulf %32, %28 : vector<6x16xf32>
    %cst_33 = arith.constant dense<0.000000e+00> : vector<6xf32>
    %47 = vector.multi_reduction <add>, %46, %cst_33 [1] : vector<6x16xf32> to vector<6xf32>
    %48 = vector.shape_cast %47 : vector<6xf32> to vector<6x1xf32>
    %49 = arith.addf %45, %48 : vector<6x1xf32>
    %c0_34 = arith.constant 0 : index
    %c0_35 = arith.constant 0 : index
    %c0_36 = arith.constant 0 : index
    %50 = vector.load %arg9[%c0_34, %c0_35, %c0_36] : memref<1x6x1xf32, #tpu.memory_space<vmem>>, vector<1x6x1xf32>
    %51 = vector.shape_cast %50 : vector<1x6x1xf32> to vector<6x1xf32>
    %52 = vector.shape_cast %49 : vector<6x1xf32> to vector<1x6x1xf32>
    tpu.vector_store %arg9[%c0_34, %c0_35, %c0_36], %52 {strides = array<i32>} : memref<1x6x1xf32, #tpu.memory_space<vmem>>, vector<1x6x1xf32>,
    %c0_i32_37 = arith.constant 0 : i32
    %53 = arith.cmpi eq, %arg1, %c0_i32_37 : i32
    %54 = arith.extui %53 : i1 to i32
    %c0_i32_38 = arith.constant 0 : i32
    %55 = arith.cmpi ne, %54, %c0_i32_38 : i32
    scf.if %55 {
      %c0_39 = arith.constant 0 : index
      %c0_40 = arith.constant 0 : index
      %c0_41 = arith.constant 0 : index
      %56 = vector.load %arg9[%c0_39, %c0_40, %c0_41] : memref<1x6x1xf32, #tpu.memory_space<vmem>>, vector<1x6x1xf32>
      %57 = vector.shape_cast %56 : vector<1x6x1xf32> to vector<6x1xf32>
      %c0_42 = arith.constant 0 : index
      %c0_43 = arith.constant 0 : index
      %c0_44 = arith.constant 0 : index
      %58 = vector.load %arg8[%c0_42, %c0_43, %c0_44] : memref<1x6x1xf32, #tpu.memory_space<vmem>>, vector<1x6x1xf32>
      %59 = vector.shape_cast %58 : vector<1x6x1xf32> to vector<6x1xf32>
      %60 = arith.divf %57, %59 : vector<6x1xf32>
      %c0_45 = arith.constant 0 : index
      %c0_46 = arith.constant 0 : index
      %c0_47 = arith.constant 0 : index
      %61 = vector.load %arg9[%c0_45, %c0_46, %c0_47] : memref<1x6x1xf32, #tpu.memory_space<vmem>>, vector<1x6x1xf32>
      %62 = vector.shape_cast %61 : vector<1x6x1xf32> to vector<6x1xf32>
      %63 = vector.shape_cast %60 : vector<6x1xf32> to vector<1x6x1xf32>
      tpu.vector_store %arg9[%c0_45, %c0_46, %c0_47], %63 {strides = array<i32>} : memref<1x6x1xf32, #tpu.memory_space<vmem>>, vector<1x6x1xf32>,
    } else {
    }
    return
  }
  func.func @transform_0(%arg0: i32, %arg1: i32) -> (i32, i32, i32) {
    %c0_i32 = arith.constant 0 : i32
    %c0_i32_0 = arith.constant 0 : i32
    return %arg0, %c0_i32, %arg1 : i32, i32, i32
  }
  func.func @transform_1(%arg0: i32, %arg1: i32) -> (i32, i32) {
    %c0_i32 = arith.constant 0 : i32
    %c0_i32_0 = arith.constant 0 : i32
    %c0_i32_1 = arith.constant 0 : i32
    return %c0_i32, %c0_i32_0 : i32, i32
  }
  func.func @transform_2(%arg0: i32, %arg1: i32) -> (i32, i32) {
    %c0_i32 = arith.constant 0 : i32
    %c0_i32_0 = arith.constant 0 : i32
    %c0_i32_1 = arith.constant 0 : i32
    return %c0_i32, %c0_i32_0 : i32, i32
  }
  func.func @transform_3(%arg0: i32, %arg1: i32) -> (i32, i32) {
    %c0_i32 = arith.constant 0 : i32
    %c0_i32_0 = arith.constant 0 : i32
    %c0_i32_1 = arith.constant 0 : i32
    return %c0_i32, %c0_i32_0 : i32, i32
  }
  func.func @transform_4(%arg0: i32, %arg1: i32) -> (i32, i32) {
    %c0_i32 = arith.constant 0 : i32
    %c0_i32_0 = arith.constant 0 : i32
    %c0_i32_1 = arith.constant 0 : i32
    return %c0_i32, %c0_i32_0 : i32, i32
  }
  func.func @transform_5(%arg0: i32, %arg1: i32) -> (i32, i32, i32) {
    %c0_i32 = arith.constant 0 : i32
    %c0_i32_0 = arith.constant 0 : i32
    return %arg0, %c0_i32, %arg1 : i32, i32, i32
  }
  func.func @transform_6(%arg0: i32, %arg1: i32) -> (i32, i32, i32) {
    %c0_i32 = arith.constant 0 : i32
    %c0_i32_0 = arith.constant 0 : i32
    %c0_i32_1 = arith.constant 0 : i32
    return %arg0, %c0_i32, %c0_i32_0 : i32, i32, i32
  }
  func.func @transform_7(%arg0: i32, %arg1: i32) -> (i32, i32, i32) {
    %c0_i32 = arith.constant 0 : i32
    %c0_i32_0 = arith.constant 0 : i32
    %c0_i32_1 = arith.constant 0 : i32
    return %arg0, %c0_i32, %c0_i32_0 : i32, i32, i32
  }
}

</mosaic_0001>

<bundles_post_ra>
// kernel: tpu_custom_call.1
= control target key start
LH: loop header
LB: loop body
LE: loop exit
PB: predicated region body
PF: predicated region fallthrough
CT: control target
= control target key end

     0   :  { %s799_s24 = smov 0   ;;  %s801_s25 = smov 0   ;;  %s873_s0 = inlined_call_operand.vmem [shape: f32[2,4,16], index: 0, kind: input, shape index: {}]   ;;  %s874_s1 = inlined_call_operand.vmem [shape: f32[6,4], index: 1, kind: input, shape index: {}]   ;;  %s875_s2 = inlined_call_operand.vmem [shape: f32[6,1], index: 2, kind: input, shape index: {}]   ;;  %s876_s3 = inlined_call_operand.vmem [shape: f32[6,4], index: 3, kind: input, shape index: {}]   ;;  %s877_s4 = inlined_call_operand.vmem [shape: f32[6,1], index: 4, kind: input, shape index: {}]   ;;  %s878_s5 = inlined_call_operand.vmem [shape: f32[2,6,16], index: 5, kind: output, shape index: {0}]   ;;  %s879_s6 = inlined_call_operand.vmem [shape: f32[2,6,1], index: 6, kind: output, shape index: {1}]   ;;  %s880_s7 = inlined_call_operand.vmem [shape: f32[2,6,1], index: 7, kind: output, shape index: {2}]  }
   0x1   :  { %s803_s26 = smov 0  }
   0x2 LB: > { %s30_s27 = sadd.s32 1, %s750_s25  ;;  %p673_p0 = scmp.ge.s32.totalorder %s754_s26, 1  ;;  %s754_s26 = sphi %s803_s26, %s18_s26   ;;  %s750_s25 = sphi %s801_s25, %s882_s25   ;;  %s746_s24 = sphi %s799_s24, %s881_s24  }
   0x3   : > { %p32_p1 = scmp.ge.s32.totalorder %s30_s27, 2  ;;  %p260_p2 = scmp.lt.s32.totalorder %s754_s26, 3 }
   0x5   : > { %s884_s27 = smov (%p32_p1, %s30_s27), 0  ;;  %p261_p3 = pnand %p673_p0, %p260_p2 }
   0x6   : > { %p304_p4 = scmp.lt.s32.totalorder (!%p261_p3), %s746_s24, 1  ;;  %v756_v0 = vmov (!%p261_p3), 0.0   ;;  %v335_v1 = vld [vmem:[%s875_s2] sm:$0x3f] (!%p261_p3)  ;;  %vm757_vm0 = vmmov (!%p261_p3), 0   ;;  %v758_v2 = vmov (!%p261_p3), 0  }
   0x7   : > { %264 = sbr.rel (%p261_p3) target bundleno = 421 (0x1a5), region = 40  ;;  %688 = vmatprep.subr.mxu0 (!%p261_p3), %v756_v0  ;;  %693 = vmatprep.subr.mxu1 (!%p261_p3), %v756_v0  ;;  %vm345_vm1 = vcmask (!%p261_p3), 1043456   ;;  %v334_v3 = vld [vmem:[%s874_s1] sm:$0x3f] (!%p261_p3)  ;;  %vm341_vm2 = vcmask (!%p261_p3), 31744   ;;  %vm330_vm3 = vcmask (!%p261_p3), 5120  }
   0x8   : > { %690 = vmatprep.mubr.msk.f32.mxu0 (!%p261_p3), %vm757_vm0, %v756_v0  ;;  %695 = vmatprep.mubr.msk.f32.mxu1 (!%p261_p3), %vm757_vm0, %v756_v0  ;;  %v419_v4 = vld [vmem:[%s876_s3] sm:$0x3f] (!%p261_p3)  ;;  %vm509_vm4 = vcmask (!%p261_p3), 128000  }
   0x9   : > { %725 = vset.pattern.permute.xlu0 (!%p261_p3), %v758_v2  ;;  %v420_v6 = vld [vmem:[%s877_s4] sm:$0x3f] (!%p261_p3) }
   0xa   : > { %338 = vperm.xlu0 (!%p261_p3), %725, %v335_v1  }
   0xe   : > { %s886_s24 = smov (!%p304_p4, %s746_s24), 1  ;;  %423 = vperm.xlu0 %725, %v420_v6  }
   0xf   : > { %s674_s30 = sshll.u32 %s886_s24, 2  ;;  %s832_s17 = sshll.u32 %s886_s24, 3 }
  0x10   : > { %s310_s10 = scalar_lea.vmem %s873_s0, %s674_s30  ;;  %s838_s20 = scalar_lea.vmem %s880_s7, %s832_s17 }
  0x11   : > { %v333_v5 = vld [vmem:[%s310_s10] sm:$0xf]  ;;  %s844_s23 = scalar_lea.vmem %s879_s6, %s832_s17  ;;  %332 = vst.msk [vmem:[%s838_s20] sm:$0x3f] %vm330_vm3, %v756_v0  ;;  %s317_s29 = scalar_lea.vmem %s878_s5, %s832_s17 }
  0x12   : > { %689 = vmatpush3.msk.msra.mxu0 %vm345_vm1, %v333_v5  ;;  %694 = vmatpush3.msk.msra.mxu1 %vm345_vm1, %v333_v5  ;;  %331 = vst.msk [vmem:[%s844_s23] sm:$0x3f] %vm330_vm3, %v756_v0 }
  0x13   : > { %691 = vmatmul.mubr.msk.f32.vlgmr.msra.gmra.mrb[0].mxu0 %vm341_vm2, %v334_v3  ;;  %696 = vmatmul.mubr.msk.f32.vlgmr.msra.gmra.mrb[0].mxu1 %vm341_vm2, %v419_v4 }
  0x18   : > { %v518_v31 = vld [vmem:[%s838_s20] sm:$0x3f] }
  0x19   : > { %v511_v28 = vld [vmem:[%s844_s23] sm:$0x3f] }
  0x89   : > { %v339_v7 = vpop.permute.xlu0 %338 }
  0x8d   : > { %v424_v8 = vpop.permute.xlu0 %423 }
  0xe6   : > { %v415_v9 = vpop.f32.mrb[0].mxu0  ;;  %v495_v10 = vpop.f32.mrb[0].mxu1 }
  0xe7   : > { %v416_v11 = vadd.f32 %v415_v9, %v339_v7  ;;  %v496_v12 = vadd.f32 %v495_v10, %v424_v8  ;;  %v692_v13 = vpop.f32.mrb[1].mxu0  ;;  %v697_v14 = vpop.f32.mrb[1].mxu1 }
  0xe9   : > { %v499_v15 = vmul.f32 0.5, %v416_v11  ;;  %v503_v16 = vmul.f32 0.5, %v496_v12 }
  0xeb   : > { %726 = vtanh.f32 %v499_v15 }
  0xec   : > { %728 = vtanh.f32 %v503_v16 }
  0xf5   : > { %v727_v17 = vpop.eup %726 }
  0xf6   : > { %v729_v18 = vpop.eup %728  ;;  %v501_v19 = vadd.f32 1.0, %v727_v17 }
  0xf7   : > { %v505_v21 = vadd.f32 1.0, %v729_v18 }
  0xf8   : > { %v502_v20 = vmul.f32 0.5, %v501_v19 }
  0xf9   : > { %v506_v24 = vmul.f32 0.5, %v505_v21 }
  0xfa   : > { %v507_v22 = vmax.f32 %v502_v20, 1e-07 }
  0xfc   : > { %v508_v23 = vmin.f32 %v507_v22, 0.9999999 }
  0xfe   : > { %v512_v25 = vsel %vm509_vm4, %v508_v23, 0.0  ;;  %510 = vst.msk [vmem:[%s317_s29] sm:$0x3f] %vm509_vm4, %v508_v23  ;;  %v519_v26 = vmul.f32 %v508_v23, %v506_v24 }
  0xff   : > { %513 = vadd.xlane.f32.xlu1 %v512_v25 }
 0x100   : > { %v520_v27 = vsel %vm509_vm4, %v519_v26, 0.0 }
 0x103   : > { %521 = vadd.xlane.f32.xlu1 %v520_v27 }
 0x18c   : > { %v514_v29 = vpop.xlane.xlu1 %513 }
 0x18d   : > { %v515_v30 = vadd.f32 %v514_v29, %v511_v28 }
 0x18f   : > { %517 = vst.msk [vmem:[%s844_s23] sm:$0x3f] %vm330_vm3, %v515_v30 }
 0x190   : > { %v522_v32 = vpop.xlane.xlu1 %521 }
 0x191   : > { %v523_v33 = vadd.f32 %v522_v32, %v518_v31 }
 0x193   : > { %524 = vst.msk [vmem:[%s838_s20] sm:$0x3f] %vm330_vm3, %v523_v33 }
 0x196   : > { %v529_v34 = vld [vmem:[%s844_s23] sm:$0x3f] }
 0x197   : > { %730 = vrcp.f32 %v529_v34 }
 0x19a   : > { %v528_v36 = vld [vmem:[%s838_s20] sm:$0x3f] }
 0x1a1   : > { %v731_v35 = vpop.eup %730 }
 0x1a2   : > { %v531_v37 = vmul.f32 %v731_v35, %v528_v36 }
 0x1a4   : > { %532 = vst.msk [vmem:[%s838_s20] sm:$0x3f] %vm330_vm3, %v531_v37 }
 0x1a5 PF: > { %s18_s26 = sadd.s32 1, %s754_s26   ;;  %s881_s24 = smov %s750_s25 }
 0x1a6   : > { %p15_p5 = scmp.ge.s32.totalorder %s18_s26, 4   ;;  %s882_s25 = smov %s884_s27 }
 0x1a8   :  { %17 = sbr.rel (!%p15_p5) target bundleno = 2 (0x2), region = 102 }

</bundles_post_ra>
